<compile_context>
chip_gen: v5e
topology: v5e:2x2
jax: 0.10.0
libtpu: 0.0.40
codegen_flags: <defaults>
</compile_context>

<pallas_src>
import math

import jax
import jax.numpy as jnp
import numpy as np
from jax import lax
from jax.experimental import pallas as pl
from jax.experimental.pallas import tpu as pltpu

_LANE = 128
_SUBLANE = 8
_VMEM_LIMIT_BYTES = 48 * 1024 * 1024     # scoped-VMEM request (< 64 MiB v7x physical)
_BLOCK_BUDGET_BYTES = 36 * 1024 * 1024   # all live block buffers (double-buffered)
_MAX_BLOCK_COLS = 16384                  # split the n axis beyond this block width


def _round_up(v, m):
    return ((v + m - 1) // m) * m


def _pick_tile_rows(num_rows, block_cols, has_acc):
    """Rows per block, from the lane-padded VMEM footprint of the block buffers."""
    in_row = _round_up(block_cols, _LANE) * 4      # (tile, block_cols) input block
    out_row = _LANE * 4                            # (tile, 1) output pads to 128 lanes
    per_row = 2 * in_row + 2 * out_row             # double-buffered input + output
    if has_acc:
        per_row += out_row                         # (tile, 1) accumulator scratch
    tile = _BLOCK_BUDGET_BYTES // per_row
    tile = max(_SUBLANE, (tile // _SUBLANE) * _SUBLANE)
    tile = min(tile, _round_up(max(num_rows, 1), _SUBLANE))
    return tile


# ---------------------------------------------------------------------------
# Kernels
# ---------------------------------------------------------------------------

def _sumsq_kernel(theta_ref, x_ref, o_ref):
    """Whole reduction axis in one block.

    theta_ref: SMEM (1,)
    x_ref:     VMEM (tile, n)
    o_ref:     VMEM (tile, 1)
    """
    x = x_ref[...]
    o_ref[...] = theta_ref[0] * jnp.sum(x * x, axis=-1, keepdims=True)


def _make_sumsq_acc_kernel(n, tn):
    """Reduction axis split over a trailing 'arbitrary' grid axis of width tn."""
    mask_tail = (n % tn) != 0

    def kernel(theta_ref, x_ref, o_ref, acc_ref):
        j = pl.program_id(1)

        @pl.when(j == 0)
        def _init():
            acc_ref[...] = jnp.zeros_like(acc_ref)

        x = x_ref[...]
        if mask_tail:
            # Zero the out-of-range columns of the last (partial) n-block.
            col = lax.broadcasted_iota(jnp.int32, x.shape, 1)
            x = jnp.where(j * tn + col < n, x, 0.0)
        acc_ref[...] += jnp.sum(x * x, axis=-1, keepdims=True)

        @pl.when(j == pl.num_programs(1) - 1)
        def _finalize():
            o_ref[...] = theta_ref[0] * acc_ref[...]

    return kernel


# ---------------------------------------------------------------------------
# Wrapper
# ---------------------------------------------------------------------------

def ynet_forward(theta, t, x, *, max_block_cols=None):
    """Pallas implementation of YNet.forward(t, x).

    theta : (1,)      parameter
    t     : (..., 1)  unused by the forward pass (kept for API fidelity)
    x     : (..., n)
    returns (..., 1)
    """
    del t  # unused, exactly as in the PyTorch module
    theta = jnp.asarray(theta, jnp.float32).reshape(1)
    x = jnp.asarray(x, jnp.float32)

    batch_shape = x.shape[:-1]
    n = int(x.shape[-1])
    b = int(math.prod(batch_shape)) if batch_shape else 1
    xf = x.reshape(b, n)   # collapses leading dims only: layout-preserving

    if max_block_cols is None:
        max_block_cols = _MAX_BLOCK_COLS
    max_block_cols = max(_LANE, (max_block_cols // _LANE) * _LANE)

    cost = pl.CostEstimate(
        flops=2 * b * n,
        transcendentals=0,
        bytes_accessed=b * _round_up(n, _LANE) * 4 + b * 4 + 4,
    )
    out_shape = jax.ShapeDtypeStruct((b, 1), jnp.float32)

    if _round_up(n, _LANE) <= max_block_cols:
        # Common case: whole reduction axis per block; 1-D grid over row blocks.
        tile = _pick_tile_rows(b, n, has_acc=False)
        out = pl.pallas_call(
            _sumsq_kernel,
            out_shape=out_shape,
            grid=(pl.cdiv(b, tile),),
            in_specs=[
                pl.BlockSpec(memory_space=pltpu.MemorySpace.SMEM),  # theta
                pl.BlockSpec((tile, n), lambda i: (i, 0)),          # x row block
            ],
            out_specs=pl.BlockSpec((tile, 1), lambda i: (i, 0)),
            compiler_params=pltpu.CompilerParams(
                dimension_semantics=("parallel",),
                vmem_limit_bytes=_VMEM_LIMIT_BYTES),
            cost_estimate=cost,
        )(theta, xf)
    else:
        # Huge n: split the reduction over a trailing "arbitrary" grid axis.
        tn = max_block_cols
        tile = _pick_tile_rows(b, tn, has_acc=True)
        out = pl.pallas_call(
            _make_sumsq_acc_kernel(n, tn),
            out_shape=out_shape,
            grid=(pl.cdiv(b, tile), pl.cdiv(n, tn)),
            in_specs=[
                pl.BlockSpec(memory_space=pltpu.MemorySpace.SMEM),  # theta
                pl.BlockSpec((tile, tn), lambda i, j: (i, j)),      # x block
            ],
            out_specs=pl.BlockSpec((tile, 1), lambda i, j: (i, 0)),
            scratch_shapes=[pltpu.VMEM((tile, 1), jnp.float32)],
            compiler_params=pltpu.CompilerParams(
                dimension_semantics=("parallel", "arbitrary"),
                vmem_limit_bytes=_VMEM_LIMIT_BYTES),
            cost_estimate=cost,
        )(theta, xf)

    return out.reshape(*batch_shape, 1)


if __name__ == "__main__":
    key = jax.random.PRNGKey(0)
    k1, k2, k3, k4, k5, k6 = jax.random.split(key, 6)

    # Parameter init matches torch.nn.Parameter(torch.tensor([-1.0])).
    theta = jnp.array([-1.0], dtype=jnp.float32)

    # Case 1: batch=8, state dim n=16.
    t1 = jax.random.uniform(k1, (8, 1), dtype=jnp.float32)
    x1 = jax.random.normal(k2, (8, 16), dtype=jnp.float32)
    out1 = jax.block_until_ready(ynet_forward(theta, t1, x1))
    ref1 = theta * jnp.sum(x1 * x1, axis=-1, keepdims=True)
    np.testing.assert_allclose(np.asarray(out1), np.asarray(ref1),
                               rtol=1e-5, atol=1e-5)

    # Case 2: multi-dim batch, n not a multiple of 128, rows not a multiple of 8
    # (exercises partial boundary blocks -- no wrapper-side padding copies).
    t2 = jax.random.uniform(k3, (2, 3, 1), dtype=jnp.float32)
    x2 = jax.random.normal(k4, (2, 3, 40), dtype=jnp.float32)
    out2 = jax.block_until_ready(ynet_forward(theta, t2, x2))
    ref2 = theta * jnp.sum(x2 * x2, axis=-1, keepdims=True)
    np.testing.assert_allclose(np.asarray(out2), np.asarray(ref2),
                               rtol=1e-5, atol=1e-5)

    # Case 3: force the split-n accumulator path with a small column budget
    # (exercises the trailing "arbitrary" reduction axis + tail masking).
    t3 = jax.random.uniform(k5, (24, 1), dtype=jnp.float32)
    x3 = jax.random.normal(k6, (24, 300), dtype=jnp.float32)
    out3 = jax.block_until_ready(ynet_forward(theta, t3, x3, max_block_cols=256))
    ref3 = theta * jnp.sum(x3 * x3, axis=-1, keepdims=True)
    np.testing.assert_allclose(np.asarray(out3), np.asarray(ref3),
                               rtol=1e-5, atol=1e-4)

    print("KERNEL_OK")
</pallas_src>

<mosaic_0001>
module attributes {stable_mosaic.version = 11 : i64} {
  func.func @_sumsq_kernel(%arg0: i32, %arg1: memref<1xf32, #tpu.memory_space<smem>>, %arg2: memref<8x16xf32, #tpu.memory_space<vmem>>, %arg3: memref<8x1xf32, #tpu.memory_space<vmem>>) attributes {dimension_semantics = [#tpu.dimension_semantics<parallel>], iteration_bounds = array<i64: 1>, scalar_prefetch = 0 : i64, scratch_operands = 0 : i64, tpu.core_type = #tpu.core_type<tc>, window_params = [{transform_indices = @transform_0, window_bounds = array<i64: 1>}, {transform_indices = @transform_1, window_bounds = array<i64: 8, 16>}, {transform_indices = @transform_2, window_bounds = array<i64: 8, 1>}]} {
    %c0 = arith.constant 0 : index
    %c0_0 = arith.constant 0 : index
    %0 = vector.load %arg2[%c0, %c0_0] : memref<8x16xf32, #tpu.memory_space<vmem>>, vector<8x16xf32>
    %c0_1 = arith.constant 0 : index
    %1 = memref.load %arg1[%c0_1] : memref<1xf32, #tpu.memory_space<smem>>
    %2 = arith.mulf %0, %0 : vector<8x16xf32>
    %cst = arith.constant dense<0.000000e+00> : vector<8xf32>
    %3 = vector.multi_reduction <add>, %2, %cst [1] : vector<8x16xf32> to vector<8xf32>
    %4 = vector.shape_cast %3 : vector<8xf32> to vector<8x1xf32>
    %5 = vector.broadcast %1 : f32 to vector<8x1xf32>
    %6 = arith.mulf %5, %4 : vector<8x1xf32>
    %c0_2 = arith.constant 0 : index
    %c0_3 = arith.constant 0 : index
    %7 = vector.load %arg3[%c0_2, %c0_3] : memref<8x1xf32, #tpu.memory_space<vmem>>, vector<8x1xf32>
    tpu.vector_store %arg3[%c0_2, %c0_3], %6 {strides = array<i32>} : memref<8x1xf32, #tpu.memory_space<vmem>>, vector<8x1xf32>,
    return
  }
  func.func @transform_0(%arg0: i32) -> i32 {
    %c0_i32 = arith.constant 0 : i32
    %c0_i32_0 = arith.constant 0 : i32
    return %c0_i32 : i32
  }
  func.func @transform_1(%arg0: i32) -> (i32, i32) {
    %c0_i32 = arith.constant 0 : i32
    %c0_i32_0 = arith.constant 0 : i32
    return %arg0, %c0_i32 : i32, i32
  }
  func.func @transform_2(%arg0: i32) -> (i32, i32) {
    %c0_i32 = arith.constant 0 : i32
    %c0_i32_0 = arith.constant 0 : i32
    return %arg0, %c0_i32 : i32, i32
  }
}

</mosaic_0001>

<bundles_post_ra>
// kernel: tpu_custom_call.1
= control target key start
LH: loop header
LB: loop body
LE: loop exit
PB: predicated region body
PF: predicated region fallthrough
CT: control target
= control target key end

     0   :  { %8 = vsyncpa [#allocation4], 0  ;;  %s69_s12 = smov [#allocation3]   ;;  %s94_s0 = inlined_call_operand.<no memory space> [shape: f32[1], index: 0, kind: input, shape index: {}]   ;;  %s95_s1 = inlined_call_operand.hbm [shape: f32[8,16], index: 1, kind: input, shape index: {}]   ;;  %s96_s2 = inlined_call_operand.vmem [shape: f32[8,1], index: 2, kind: output, shape index: {}]  }
   0x1   :  { %s16_s11 = sshll.u32 %s95_s1, 4  ;;  %s18_s13 = sshll.u32 %s69_s12, 4  ;;  %s17_s11 = int_to_ptr.hbm [resolvable:$true] %s16_s11  ;;  %s19_s13 = int_to_ptr.vmem [resolvable:$true] %s18_s13 }
   0x2   :  { %21 = dma.hbm_to_vmem [thread:$0]  %s17_s11, 128, %s19_s13, [#allocation4]  }
   0x3   :  { %67 = dma.done.wait [#allocation4], 128  }
   0x4   :  { %68 = vsyncadd [#allocation4], 4294967168  ;;  %v26_v0 = vld [vmem:[#allocation3] sm:$0xff]  ;;  %vm29_vm0 = vcmask 130048   ;;  %v33_v3 = vstv %s94_s0  ;;  %vm35_vm1 = vcmask 7168  }
   0x5   :  { %v28_v1 = vmul.f32 %v26_v0, %v26_v0 }
   0x7   :  { %v30_v2 = vsel %vm29_vm0, %v28_v1, 0.0 }
   0x8   :  { %31 = vadd.xlane.f32.xlu0 %v30_v2 }
  0x7b   :  { %v32_v4 = vpop.xlane.xlu0 %31 }
  0x7c   :  { %v34_v5 = vmul.f32 %v33_v3, %v32_v4 }
  0x7e   :  { %36 = vst.msk [vmem:[%s96_s2] sm:$0xff] %vm35_vm1, %v34_v5 }
  0x7f   :  { %41 = vsyncpa [#allocation4], 1 }

</bundles_post_ra>
